<compile_context>
chip_gen: v7x
topology: tpu7x:2x2x1
jax: 0.10.0
libtpu: 0.0.40
codegen_flags: <defaults>
</compile_context>

<pallas_src>
import math

import jax
import jax.numpy as jnp
from jax.experimental import pallas as pl
from jax.experimental.pallas import tpu as pltpu


# ----------------------------- kernels ------------------------------------


def proj_kernel(x_ref, wt_ref, b_ref, h_ref):
    """h_tile = x_tile @ W_t + b  (bf16 operands, f32 accumulate, bf16 out)."""
    h = jnp.dot(x_ref[...], wt_ref[...], preferred_element_type=jnp.float32)
    h_ref[...] = (h + b_ref[...]).astype(h_ref.dtype)


def agg_kernel(cnt_ref, idx_ref, a_ref, h_ref, o_ref):
    """out_tile += A_block @ h_block over the compacted nonzero-block list.

    Grid: (dst-node tiles [parallel], compacted src-tile slots [arbitrary]).
    cnt_ref / idx_ref are scalar-prefetched SMEM arrays; the index_maps use
    idx_ref so empty blocks are never DMA'd.  o_ref (f32, index (i, 0)) stays
    resident across the reduction axis and serves as the accumulator.
    """
    del idx_ref  # consumed only by the index_maps
    i = pl.program_id(0)
    k = pl.program_id(1)

    @pl.when(k == 0)
    def _():
        o_ref[...] = jnp.zeros_like(o_ref)

    @pl.when(k < cnt_ref[i])
    def _():
        o_ref[...] += jnp.dot(
            a_ref[...], h_ref[...], preferred_element_type=jnp.float32
        )


# ----------------------------- helpers -------------------------------------


def _round_up(v, m):
    return ((v + m - 1) // m) * m


def _pad_axis_to(a, axis, target):
    pad = target - a.shape[axis]
    if pad == 0:
        return a
    widths = [(0, 0)] * a.ndim
    widths[axis] = (0, pad)
    return jnp.pad(a, widths)


def _pick_tile(total, cap, quantum=128):
    """Largest multiple of `quantum` that divides `total` and is <= cap."""
    t = max((min(cap, total) // quantum) * quantum, quantum)
    while total % t:
        t -= quantum
    return t


# ----------------------------- graph prep (amortized) ----------------------


def prepare_graph(adj, *, tile_m=512, tile_k=256):
    """One-off per-graph preprocessing. Reuse the result across layers/steps.

    Pads the adjacency, casts it to bf16 once, and builds compacted per-dst-tile
    lists of nonzero src-tile indices (block-sparse skip metadata).
    """
    n_dst, n_src = adj.shape
    tile_m = _pick_tile(_round_up(n_dst, 128), tile_m)
    tile_k = _pick_tile(_round_up(n_src, 128), tile_k)
    n_dst_pad = _round_up(n_dst, tile_m)
    n_src_pad = _round_up(n_src, tile_k)
    num_m = n_dst_pad // tile_m
    num_k = n_src_pad // tile_k

    # Single pass over the f32 adjacency: zero-pad + cast to bf16.
    adj_bf16 = _pad_axis_to(_pad_axis_to(adj, 0, n_dst_pad), 1, n_src_pad).astype(
        jnp.bfloat16
    )

    # Block-sparsity metadata derived from the SAME bf16 array the kernel
    # multiplies, so flags and data always agree (no flush-to-zero mismatch).
    blk_nnz = (
        (adj_bf16 != 0).reshape(num_m, tile_m, num_k, tile_k).any(axis=(1, 3))
    )
    cnt = blk_nnz.sum(axis=1).astype(jnp.int32)
    max_nnz = max(int(jnp.max(cnt)), 1)

    # Compacted nonzero src-tile indices, padded slots repeat the last valid
    # index (unchanged block index -> pipeline skips the redundant DMA).
    key = jnp.where(blk_nnz, 0, 1) * num_k + jnp.arange(num_k)[None, :]
    order = jnp.argsort(key, axis=1).astype(jnp.int32)  # nonzero cols first
    kk = jnp.arange(max_nnz)[None, :]
    last_valid = jnp.maximum(cnt - 1, 0)[:, None]
    idx = jnp.take_along_axis(order[:, :max_nnz], jnp.minimum(kk, last_valid), axis=1)

    return dict(
        adj_bf16=adj_bf16,
        cnt=cnt,
        idx=idx.reshape(-1).astype(jnp.int32),
        max_nnz=max_nnz,
        tile_m=tile_m,
        tile_k=tile_k,
        n_dst=n_dst,
        n_src=n_src,
        n_dst_pad=n_dst_pad,
        n_src_pad=n_src_pad,
    )
    # TODO(synk): true edge-list (CSR) aggregation with gather-DMA is not
    # implemented; the graph is expressed as a dense weighted adjacency.


# ----------------------------- pallas wrappers ------------------------------


def linear_project(x_bf16, wt_bf16, bias2d, *, tile_rows):
    """h = x @ w_t + bias, emitted as bf16. Rows must be a multiple of tile_rows."""
    n, f_in = x_bf16.shape
    f_out = wt_bf16.shape[1]
    return pl.pallas_call(
        proj_kernel,
        out_shape=jax.ShapeDtypeStruct((n, f_out), jnp.bfloat16),
        grid_spec=pltpu.PrefetchScalarGridSpec(
            num_scalar_prefetch=0,
            grid=(n // tile_rows,),
            in_specs=[
                pl.BlockSpec((tile_rows, f_in), lambda i: (i, 0)),
                pl.BlockSpec((f_in, f_out), lambda i: (0, 0)),
                pl.BlockSpec((1, f_out), lambda i: (0, 0)),
            ],
            out_specs=pl.BlockSpec((tile_rows, f_out), lambda i: (i, 0)),
        ),
        compiler_params=pltpu.CompilerParams(
            dimension_semantics=("parallel",),
            vmem_limit_bytes=48 * 1024 * 1024,
        ),
    )(x_bf16, wt_bf16, bias2d)


def aggregate(graph, h_bf16):
    """out = adj @ h with block-sparse DMA skipping and f32 output accumulation."""
    adj = graph["adj_bf16"]
    n_dst_pad, _ = adj.shape
    f_out = h_bf16.shape[1]
    tile_m = graph["tile_m"]
    tile_k = graph["tile_k"]
    num_m = n_dst_pad // tile_m
    max_nnz = graph["max_nnz"]

    adj_spec = pl.BlockSpec(
        (tile_m, tile_k), lambda i, k, cnt, idx: (i, idx[i * max_nnz + k])
    )
    h_spec = pl.BlockSpec(
        (tile_k, f_out), lambda i, k, cnt, idx: (idx[i * max_nnz + k], 0)
    )
    out_spec = pl.BlockSpec((tile_m, f_out), lambda i, k, cnt, idx: (i, 0))

    return pl.pallas_call(
        agg_kernel,
        out_shape=jax.ShapeDtypeStruct((n_dst_pad, f_out), jnp.float32),
        grid_spec=pltpu.PrefetchScalarGridSpec(
            num_scalar_prefetch=2,  # cnt, idx -> SMEM, fed to index_maps
            grid=(num_m, max_nnz),
            in_specs=[adj_spec, h_spec],
            out_specs=out_spec,
        ),
        compiler_params=pltpu.CompilerParams(
            # dst tiles independent -> parallel (megacore on v7x when num_m>=2);
            # compacted contraction axis carries the accumulator -> arbitrary.
            dimension_semantics=("parallel", "arbitrary"),
            vmem_limit_bytes=48 * 1024 * 1024,  # safe on v7x's 64 MiB VMEM
        ),
    )(graph["cnt"], graph["idx"], adj, h_bf16)


def gcn_conv_dgl(x, graph, weight, bias, *, proj_tile=512):
    """out = adj @ (x @ weight.T + bias)  -- GCNConv_dgl forward."""
    n, f_in = x.shape
    f_out = weight.shape[0]
    assert graph["n_src"] == n and graph["n_dst"] == n

    f_out_pad = _round_up(f_out, 128)  # lane-dense stores
    f_in_pad = _round_up(f_in, 128)    # lane-dense loads
    n_src_pad = graph["n_src_pad"]

    # bf16 MXU operands for the projection (accumulation stays f32).
    w_t = _pad_axis_to(
        _pad_axis_to(weight.T, 0, f_in_pad), 1, f_out_pad
    ).astype(jnp.bfloat16)
    bias2d = _pad_axis_to(bias.reshape(1, f_out), 1, f_out_pad)  # f32
    x_p = _pad_axis_to(_pad_axis_to(x, 0, n_src_pad), 1, f_in_pad).astype(jnp.bfloat16)

    tile_rows = _pick_tile(n_src_pad, proj_tile)
    h = linear_project(x_p, w_t, bias2d, tile_rows=tile_rows)
    # NOTE: padded rows of h equal the bias (0 @ W + b); they never leak into
    # the output because the padded adjacency columns are exactly zero.

    out = aggregate(graph, h)
    return out[:n, :f_out]


# ----------------------------- test ----------------------------------------


if __name__ == "__main__":
    key = jax.random.PRNGKey(0)
    k_x, k_w, k_b, k_edge, k_ew = jax.random.split(key, 5)

    # Small, TPU-friendly sizes; 128-granular tiles -> 3x3 block grid so the
    # compacted block-sparse path (variable counts + DMA skip) is exercised.
    num_nodes = 384      # N
    input_size = 64      # F_in
    output_size = 128    # F_out
    tile = 128

    # Node features.
    x = jax.random.normal(k_x, (num_nodes, input_size), dtype=jnp.float32)

    # Deterministic parameter init (synthetic; matches nn.Linear shapes).
    limit = 1.0 / math.sqrt(input_size)
    weight = jax.random.uniform(
        k_w, (output_size, input_size), minval=-limit, maxval=limit,
        dtype=jnp.float32)
    bias = jax.random.uniform(
        k_b, (output_size,), minval=-limit, maxval=limit, dtype=jnp.float32)

    # Synthetic weighted graph, stored densely as A[dst, src] = w_{src->dst}.
    edge_mask = jax.random.uniform(k_edge, (num_nodes, num_nodes)) < 0.1
    edge_w = jax.random.uniform(k_ew, (num_nodes, num_nodes), dtype=jnp.float32)
    adj = jnp.where(edge_mask, edge_w, 0.0).astype(jnp.float32)
    # Zero out whole (dst-tile, src-tile) blocks: row tile 0 keeps 1 nonzero
    # block, row tile 1 keeps 2, row tile 2 keeps 3 -> cnt = [1, 2, 3].
    adj = adj.at[:128, 128:].set(0.0)
    adj = adj.at[128:256, 256:].set(0.0)

    # Per-graph preprocessing (amortized across layers in a real model).
    graph = prepare_graph(adj, tile_m=tile, tile_k=tile)

    out = gcn_conv_dgl(x, graph, weight, bias)
    out = jax.block_until_ready(out)
    assert out.shape == (num_nodes, output_size)

    # References.
    hi = jax.lax.Precision.HIGHEST
    ref_h_f32 = jnp.dot(x, weight.T, precision=hi) + bias
    ref_f32 = jnp.dot(adj, ref_h_f32, precision=hi)
    # Reference matching the kernel's bf16 quantization of operands.
    xb = x.astype(jnp.bfloat16).astype(jnp.float32)
    wb = weight.astype(jnp.bfloat16).astype(jnp.float32)
    h_q = (jnp.dot(xb, wb.T, precision=hi) + bias).astype(jnp.bfloat16).astype(
        jnp.float32)
    adj_q = adj.astype(jnp.bfloat16).astype(jnp.float32)
    ref_matched = jnp.dot(adj_q, h_q, precision=hi)

    assert jnp.allclose(out, ref_matched, atol=2e-2, rtol=2e-2), \
        "mismatch vs bf16-matched reference"
    assert jnp.allclose(out, ref_f32, atol=2e-1, rtol=2e-1), \
        "mismatch vs f32 reference"

    print("KERNEL_OK")
</pallas_src>

<mosaic_0001>
module attributes {stable_mosaic.version = 11 : i64} {
  func.func @proj_kernel(%arg0: i32, %arg1: memref<384x128xbf16, #tpu.memory_space<vmem>>, %arg2: memref<128x128xbf16, #tpu.memory_space<vmem>>, %arg3: memref<1x128xf32, #tpu.memory_space<vmem>>, %arg4: memref<384x128xbf16, #tpu.memory_space<vmem>>) attributes {dimension_semantics = [#tpu.dimension_semantics<parallel>], iteration_bounds = array<i64: 1>, scalar_prefetch = 0 : i64, scratch_operands = 0 : i64, tpu.core_type = #tpu.core_type<tc>, window_params = [{transform_indices = @transform_0, window_bounds = array<i64: 384, 128>}, {pipeline_mode = #tpu.pipeline_mode<synchronous>, transform_indices = @transform_1, window_bounds = array<i64: 128, 128>}, {pipeline_mode = #tpu.pipeline_mode<synchronous>, transform_indices = @transform_2, window_bounds = array<i64: 1, 128>}, {transform_indices = @transform_3, window_bounds = array<i64: 384, 128>}]} {
    %c0 = arith.constant 0 : index
    %c0_0 = arith.constant 0 : index
    %0 = vector.load %arg1[%c0, %c0_0] : memref<384x128xbf16, #tpu.memory_space<vmem>>, vector<384x128xbf16>
    %c0_1 = arith.constant 0 : index
    %c0_2 = arith.constant 0 : index
    %1 = vector.load %arg2[%c0_1, %c0_2] : memref<128x128xbf16, #tpu.memory_space<vmem>>, vector<128x128xbf16>
    %cst = arith.constant dense<0.000000e+00> : vector<384x128xf32>
    %2 = tpu.matmul %0, %1, %cst {dimension_numbers = #tpu.dot_dimension_numbers<[1], [0], [0], [1], [0, 0, 1, 1], [], []>} : vector<384x128xbf16>, vector<128x128xbf16>, vector<384x128xf32> -> vector<384x128xf32>
    %c0_3 = arith.constant 0 : index
    %c0_4 = arith.constant 0 : index
    %3 = vector.load %arg3[%c0_3, %c0_4] : memref<1x128xf32, #tpu.memory_space<vmem>>, vector<1x128xf32>
    %4 = vector.broadcast %3 : vector<1x128xf32> to vector<384x128xf32>
    %5 = arith.addf %2, %4 : vector<384x128xf32>
    %6 = arith.truncf %5 : vector<384x128xf32> to vector<384x128xbf16>
    %c0_5 = arith.constant 0 : index
    %c0_6 = arith.constant 0 : index
    %7 = vector.load %arg4[%c0_5, %c0_6] : memref<384x128xbf16, #tpu.memory_space<vmem>>, vector<384x128xbf16>
    tpu.vector_store %arg4[%c0_5, %c0_6], %6 {strides = array<i32>} : memref<384x128xbf16, #tpu.memory_space<vmem>>, vector<384x128xbf16>,
    return
  }
  func.func @transform_0(%arg0: i32) -> (i32, i32) {
    %c0_i32 = arith.constant 0 : i32
    %c0_i32_0 = arith.constant 0 : i32
    return %arg0, %c0_i32 : i32, i32
  }
  func.func @transform_1(%arg0: i32) -> (i32, i32) {
    %c0_i32 = arith.constant 0 : i32
    %c0_i32_0 = arith.constant 0 : i32
    %c0_i32_1 = arith.constant 0 : i32
    return %c0_i32, %c0_i32_0 : i32, i32
  }
  func.func @transform_2(%arg0: i32) -> (i32, i32) {
    %c0_i32 = arith.constant 0 : i32
    %c0_i32_0 = arith.constant 0 : i32
    %c0_i32_1 = arith.constant 0 : i32
    return %c0_i32, %c0_i32_0 : i32, i32
  }
  func.func @transform_3(%arg0: i32) -> (i32, i32) {
    %c0_i32 = arith.constant 0 : i32
    %c0_i32_0 = arith.constant 0 : i32
    return %arg0, %c0_i32 : i32, i32
  }
}

</mosaic_0001>

<bundles_post_ra>
// kernel: tpu_custom_call.1
= control target key start
LH: loop header
LB: loop body
LE: loop exit
PB: predicated region body
PF: predicated region fallthrough
CT: control target
= control target key end

     0   :  { %8 = vsyncpa [#allocation3], 0  ;;  %s1406_s0 = inlined_call_operand.hbm [shape: bf16[384,128], index: 0, kind: input, shape index: {}]   ;;  %s1407_s1 = inlined_call_operand.hbm [shape: bf16[128,128], index: 1, kind: input, shape index: {}]   ;;  %s1408_s2 = inlined_call_operand.vmem [shape: f32[1,128], index: 2, kind: input, shape index: {}]   ;;  %s1409_s3 = inlined_call_operand.hbm [shape: bf16[384,128], index: 3, kind: output, shape index: {}]  }
   0x1   :  { %9 = vsyncpa [#allocation6], 0 }
   0x2   :  { %10 = vsyncpa [#allocation4], 0  ;;  %s1283_s12 = smov [#allocation2]   ;;  %s1211_s16 = scalar_lea.hbm %s1406_s0, 3072 }
   0x3   :  { %s16_s13 = sshll.u32 %s1283_s12, 4  ;;  %p1212_p0 = scmp.ne.s32.totalorder %s1406_s0, %s1211_s16  ;;  %s17_s13 = int_to_ptr.vmem [resolvable:$true] %s16_s13 }
   0x4   :  { %p1215_p1 = scmp.lt.u32.totalorder %s1211_s16, %s1406_s0 }
   0x6   :  { %p1217_p2 = pnand %p1215_p1, %p1212_p0 }
   0x8   :  { %1220 = shalt.err (!%p1217_p2)
}
   0x9   :  { %s1221_s21 = scalar_lea.vmem %s17_s13, 3072  ;;  %p1226_p4 = scmp.lt.s32.totalorder %s17_s13, %s17_s13 }
   0xa   :  { %p1222_p3 = scmp.ne.s32.totalorder %s17_s13, %s1221_s21  ;;  %p1227_p5 = scmp.lt.s32.totalorder %s1221_s21, %s1221_s21 }
   0xc   :  { %p1228_p6 = por %p1227_p5, %p1226_p4 }
   0xe   :  { %p1229_p7 = pnand %p1228_p6, %p1222_p3 }
  0x10   :  { %1232 = shalt.err (!%p1229_p7)
}
  0x11   :  { %s1284_s22 = smov 64   ;;  %s1285_s23 = smov 4  }
  0x12   :  { %22 = dma.hbm_to_vmem [thread:$0]  %s1406_s0, 3072, %s17_s13, [#allocation3], %s1284_s22, %s1284_s22, %s1285_s23  }
  0x13   :  { %s1286_s26 = smov [#allocation5]   ;;  %s1233_s30 = scalar_lea.hbm %s1407_s1, 1024 }
  0x14   :  { %s28_s27 = sshll.u32 %s1286_s26, 4  ;;  %p1234_p8 = scmp.ne.s32.totalorder %s1407_s1, %s1233_s30  ;;  %s29_s27 = int_to_ptr.vmem [resolvable:$true] %s28_s27 }
  0x15   :  { %p1237_p9 = scmp.lt.u32.totalorder %s1233_s30, %s1407_s1 }
  0x17   :  { %p1239_p10 = pnand %p1237_p9, %p1234_p8 }
  0x19   :  { %1242 = shalt.err (!%p1239_p10)
}
  0x1a   :  { %s1243_s8 = scalar_lea.vmem %s29_s27, 1024  ;;  %p1248_p12 = scmp.lt.s32.totalorder %s29_s27, %s29_s27 }
  0x1b   :  { %p1244_p11 = scmp.ne.s32.totalorder %s29_s27, %s1243_s8  ;;  %p1249_p13 = scmp.lt.s32.totalorder %s1243_s8, %s1243_s8 }
  0x1d   :  { %p1250_p0 = por %p1249_p13, %p1248_p12 }
  0x1f   :  { %p1251_p1 = pnand %p1250_p0, %p1244_p11 }
  0x21   :  { %1254 = shalt.err (!%p1251_p1)
}
  0x22   :  { %34 = dma.hbm_to_vmem [thread:$0]  %s1407_s1, 1024, %s29_s27, [#allocation6], %s1284_s22, %s1284_s22, %s1285_s23  }
  0x23   :  { %1277 = dma.done.wait [#allocation3], 3072  }
  0x24   :  { %1278 = vsyncadd [#allocation3], 4294964224 }
  0x25   :  { %1279 = dma.done.wait [#allocation6], 1024  }
  0x26   :  { %1280 = vsyncadd [#allocation6], 4294966272  ;;  %v1179_v0 = vld [vmem:[#allocation5] sm:$0xff]   ;;  %v1180_v1 = vld [vmem:[#allocation5 + $0x8] sm:$0xff]  }
  0x27   :  { %1094 = vmatprep.subr.bf16.mxu0 %v1179_v0  ;;  %1158 = vmatprep.subr.bf16.mxu1 %v1179_v0  ;;  %v1181_v2 = vld [vmem:[#allocation5 + $0x10] sm:$0xff]   ;;  %v1182_v3 = vld [vmem:[#allocation5 + $0x18] sm:$0xff]   ;;  %v1187_v4 = vld [vmem:[#allocation2] sm:$0xff]  }
  0x28   :  { %1095 = vmatpush3.bf16.msra.mxu0 %v1179_v0  ;;  %1166 = vmatpush3.bf16.msra.mxu1 %v1179_v0  ;;  %v1188_v5 = vld [vmem:[#allocation2 + $0x60] sm:$0xff]   ;;  %v1184_v7 = vld [vmem:[#allocation5 + $0x28] sm:$0xff]   ;;  %v1185_v8 = vld [vmem:[#allocation5 + $0x30] sm:$0xff]  }
  0x29   :  { %1096 = vmatprep.subr.bf16.mxu0 %v1180_v1  ;;  %1159 = vmatprep.subr.bf16.mxu1 %v1180_v1  ;;  %v1183_v6 = vld [vmem:[#allocation5 + $0x20] sm:$0xff]   ;;  %v1186_v9 = vld [vmem:[#allocation5 + $0x38] sm:$0xff]   ;;  %v1189_v10 = vld [vmem:[#allocation2 + $0x8] sm:$0xff]  }
  0x2a   :  { %1110 = vmatprep.mubr.bf16.mxu0 %v1187_v4  ;;  %1134 = vmatprep.mubr.bf16.mxu1 %v1188_v5  ;;  %v1190_v11 = vld [vmem:[#allocation2 + $0x68] sm:$0xff]   ;;  %v1191_v12 = vld [vmem:[#allocation2 + $0x10] sm:$0xff]   ;;  %v1193_v14 = vld [vmem:[#allocation2 + $0x18] sm:$0xff]  }
  0x2b   :  { %v1192_v13 = vld [vmem:[#allocation2 + $0x70] sm:$0xff]   ;;  %v1194_v15 = vld [vmem:[#allocation2 + $0x78] sm:$0xff]   ;;  %v1195_v16 = vld [vmem:[#allocation2 + $0x20] sm:$0xff]  }
  0x2c   :  { %1097 = vmatpush3.bf16.msra.mxu0 %v1180_v1  ;;  %1167 = vmatpush3.bf16.msra.mxu1 %v1180_v1  ;;  %v1196_v17 = vld [vmem:[#allocation2 + $0x80] sm:$0xff]   ;;  %v1197_v18 = vld [vmem:[#allocation2 + $0x28] sm:$0xff]   ;;  %v1199_v20 = vld [vmem:[#allocation2 + $0x30] sm:$0xff]  }
  0x2d   :  { %1098 = vmatprep.subr.bf16.mxu0 %v1181_v2  ;;  %1160 = vmatprep.subr.bf16.mxu1 %v1181_v2  ;;  %v1198_v19 = vld [vmem:[#allocation2 + $0x88] sm:$0xff]   ;;  %v1200_v21 = vld [vmem:[#allocation2 + $0x90] sm:$0xff]   ;;  %v1201_v22 = vld [vmem:[#allocation2 + $0x38] sm:$0xff]  }
  0x2e   :  { %v1202_v23 = vld [vmem:[#allocation2 + $0x98] sm:$0xff]   ;;  %v1203_v24 = vld [vmem:[#allocation2 + $0x40] sm:$0xff]   ;;  %v1205_v26 = vld [vmem:[#allocation2 + $0x48] sm:$0xff]  }
  0x2f   :  { %v1204_v25 = vld [vmem:[#allocation2 + $0xa0] sm:$0xff]   ;;  %v1206_v27 = vld [vmem:[#allocation2 + $0xa8] sm:$0xff]   ;;  %v1207_v28 = vld [vmem:[#allocation2 + $0x50] sm:$0xff]  }
  0x30   :  { %1099 = vmatpush3.bf16.msra.mxu0 %v1181_v2  ;;  %1168 = vmatpush3.bf16.msra.mxu1 %v1181_v2  ;;  %v1208_v29 = vld [vmem:[#allocation2 + $0xb0] sm:$0xff]   ;;  %v1209_v30 = vld [vmem:[#allocation2 + $0x58] sm:$0xff]   ;;  %v1341_v33 = vld [vmem:[%s1408_s2] ss:$0 sm:$0xff]  ;;  %s1287_s2 = smov [#allocation7]  }
  0x31   :  { %1100 = vmatprep.subr.bf16.mxu0 %v1182_v3  ;;  %1161 = vmatprep.subr.bf16.mxu1 %v1182_v3  ;;  %v1210_v31 = vld [vmem:[#allocation2 + $0xb8] sm:$0xff]   ;;  %s777_s11 = sshll.u32 %s1287_s2, 4  ;;  %s778_s11 = int_to_ptr.vmem [resolvable:$true] %s777_s11 }
  0x32   :  { %s1255_s12 = scalar_lea.vmem %s778_s11, 3072  ;;  %p1260_p3 = scmp.lt.s32.totalorder %s778_s11, %s778_s11 }
  0x33   :  { %p1256_p2 = scmp.ne.s32.totalorder %s778_s11, %s1255_s12  ;;  %p1261_p4 = scmp.lt.s32.totalorder %s1255_s12, %s1255_s12 }
  0x34   :  { %1101 = vmatpush3.bf16.msra.mxu0 %v1182_v3  ;;  %1169 = vmatpush3.bf16.msra.mxu1 %v1182_v3 }
  0x35   :  { %1102 = vmatprep.subr.bf16.mxu0 %v1183_v6  ;;  %1162 = vmatprep.subr.bf16.mxu1 %v1183_v6  ;;  %p1262_p5 = por %p1261_p4, %p1260_p3 }
  0x37   :  { %p1263_p6 = pnand %p1262_p5, %p1256_p2 }
  0x38   :  { %1103 = vmatpush3.bf16.msra.mxu0 %v1183_v6  ;;  %1170 = vmatpush3.bf16.msra.mxu1 %v1183_v6 }
  0x39   :  { %1104 = vmatprep.subr.bf16.mxu0 %v1184_v7  ;;  %1163 = vmatprep.subr.bf16.mxu1 %v1184_v7 }
  0x3c   :  { %1105 = vmatpush3.bf16.msra.mxu0 %v1184_v7  ;;  %1171 = vmatpush3.bf16.msra.mxu1 %v1184_v7 }
  0x3d   :  { %1106 = vmatprep.subr.bf16.mxu0 %v1185_v8  ;;  %1164 = vmatprep.subr.bf16.mxu1 %v1185_v8 }
  0x40   :  { %1107 = vmatpush3.bf16.msra.mxu0 %v1185_v8  ;;  %1172 = vmatpush3.bf16.msra.mxu1 %v1185_v8 }
  0x41   :  { %1108 = vmatprep.subr.bf16.mxu0 %v1186_v9  ;;  %1165 = vmatprep.subr.bf16.mxu1 %v1186_v9 }
  0x44   :  { %1109 = vmatpush3.bf16.msra.mxu0 %v1186_v9  ;;  %1173 = vmatpush3.bf16.msra.mxu1 %v1186_v9 }
  0x47   :  { %1111 = vmatmul.mubr.bf16.vlgmr.msra.gmra.mrb[0].mxu0 %v1189_v10  ;;  %1135 = vmatmul.mubr.bf16.vlgmr.msra.gmra.mrb[0].mxu1 %v1190_v11 }
  0x48   :  { %1114 = vmatprep.mubr.bf16.mxu0 %v1191_v12  ;;  %1138 = vmatprep.mubr.bf16.mxu1 %v1192_v13 }
  0x4f   :  { %1115 = vmatmul.mubr.bf16.gmra.mrb[4].mxu0 %v1193_v14  ;;  %1139 = vmatmul.mubr.bf16.gmra.mrb[4].mxu1 %v1194_v15 }
  0x50   :  { %1118 = vmatprep.mubr.bf16.mxu0 %v1195_v16  ;;  %1142 = vmatprep.mubr.bf16.mxu1 %v1196_v17 }
  0x57   :  { %1119 = vmatmul.mubr.bf16.gmra.mrb[8].mxu0 %v1197_v18  ;;  %1143 = vmatmul.mubr.bf16.gmra.mrb[8].mxu1 %v1198_v19 }
  0x58   :  { %1122 = vmatprep.mubr.bf16.mxu0 %v1199_v20  ;;  %1146 = vmatprep.mubr.bf16.mxu1 %v1200_v21 }
  0x5f   :  { %1123 = vmatmul.mubr.bf16.gmra.mrb[12].mxu0 %v1201_v22  ;;  %1147 = vmatmul.mubr.bf16.gmra.mrb[12].mxu1 %v1202_v23 }
  0x60   :  { %1126 = vmatprep.mubr.bf16.mxu0 %v1203_v24  ;;  %1150 = vmatprep.mubr.bf16.mxu1 %v1204_v25 }
  0x67   :  { %1127 = vmatmul.mubr.bf16.gmra.mrb[16].mxu0 %v1205_v26  ;;  %1151 = vmatmul.mubr.bf16.gmra.mrb[16].mxu1 %v1206_v27 }
  0x68   :  { %1130 = vmatprep.mubr.bf16.mxu0 %v1207_v28  ;;  %1154 = vmatprep.mubr.bf16.mxu1 %v1208_v29 }
  0x6f   :  { %1131 = vmatmul.mubr.bf16.gmra.mrb[20].mxu0 %v1209_v30  ;;  %1155 = vmatmul.mubr.bf16.gmra.mrb[20].mxu1 %v1210_v31 }
 0x11a   :  { %v1112_v32 = vpop.f32.mrb[0].mxu0  ;;  %v1136_v34 = vpop.f32.mrb[0].mxu1 }
 0x11b   :  { %v341_v35 = vpop.f32.mrb[1].mxu0  ;;  %v437_v36 = vpop.f32.mrb[1].mxu1  ;;  %v350_v39 = vadd.f32 %v1112_v32, %v1341_v33  ;;  %v446_v40 = vadd.f32 %v1136_v34, %v1341_v33 }
 0x11c   :  { %v1113_v37 = vpop.f32.mrb[2].mxu0  ;;  %v1137_v38 = vpop.f32.mrb[2].mxu1  ;;  %v342_v45 = vadd.f32 %v1341_v33, %v341_v35  ;;  %v438_v46 = vadd.f32 %v1341_v33, %v437_v36 }
 0x11d   :  { %v353_v41 = vadd.f32 %v1113_v37, %v1341_v33  ;;  %v449_v42 = vadd.f32 %v1137_v38, %v1341_v33  ;;  %v344_v43 = vpop.f32.mrb[3].mxu0  ;;  %v440_v44 = vpop.f32.mrb[3].mxu1 }
 0x11e   :  { %v345_v47 = vadd.f32 %v1341_v33, %v344_v43  ;;  %v441_v48 = vadd.f32 %v1341_v33, %v440_v44 }
 0x11f   :  { %v927_v49 = vpack.c.bf16 %v353_v41, %v350_v39  ;;  %v987_v50 = vpack.c.bf16 %v449_v42, %v446_v40 }
 0x120   :  { %v922_v51 = vpack.c.bf16 %v345_v47, %v342_v45  ;;  %v982_v52 = vpack.c.bf16 %v441_v48, %v438_v46 }
 0x121   :  { %1039 = vst [vmem:[#allocation7 + $0x8] sm:$0xff] %v927_v49   ;;  %1051 = vst [vmem:[#allocation7 + $0x68] sm:$0xff] %v987_v50  }
 0x122   :  { %923 = vst [vmem:[#allocation7] sm:$0xff] %v922_v51   ;;  %1050 = vst [vmem:[#allocation7 + $0x60] sm:$0xff] %v982_v52   ;;  %v1116_v53 = vpop.f32.mrb[4].mxu0  ;;  %v1140_v54 = vpop.f32.mrb[4].mxu1 }
 0x123   :  { %v357_v55 = vpop.f32.mrb[5].mxu0  ;;  %v453_v56 = vpop.f32.mrb[5].mxu1  ;;  %v366_v59 = vadd.f32 %v1116_v53, %v1341_v33  ;;  %v462_v60 = vadd.f32 %v1140_v54, %v1341_v33 }
 0x124   :  { %v1117_v57 = vpop.f32.mrb[6].mxu0  ;;  %v1141_v58 = vpop.f32.mrb[6].mxu1  ;;  %v358_v1 = vadd.f32 %v1341_v33, %v357_v55  ;;  %v454_v2 = vadd.f32 %v1341_v33, %v453_v56 }
 0x125   :  { %v369_v61 = vadd.f32 %v1117_v57, %v1341_v33  ;;  %v465_v62 = vadd.f32 %v1141_v58, %v1341_v33  ;;  %v360_v63 = vpop.f32.mrb[7].mxu0  ;;  %v456_v0 = vpop.f32.mrb[7].mxu1 }
 0x126   :  { %v361_v3 = vadd.f32 %v1341_v33, %v360_v63  ;;  %v457_v4 = vadd.f32 %v1341_v33, %v456_v0 }
 0x127   :  { %v937_v5 = vpack.c.bf16 %v369_v61, %v366_v59  ;;  %v997_v6 = vpack.c.bf16 %v465_v62, %v462_v60 }
 0x128   :  { %v932_v7 = vpack.c.bf16 %v361_v3, %v358_v1  ;;  %v992_v8 = vpack.c.bf16 %v457_v4, %v454_v2 }
 0x129   :  { %1041 = vst [vmem:[#allocation7 + $0x18] sm:$0xff] %v937_v5   ;;  %1053 = vst [vmem:[#allocation7 + $0x78] sm:$0xff] %v997_v6  }
 0x12a   :  { %1040 = vst [vmem:[#allocation7 + $0x10] sm:$0xff] %v932_v7   ;;  %1052 = vst [vmem:[#allocation7 + $0x70] sm:$0xff] %v992_v8   ;;  %v1120_v9 = vpop.f32.mrb[8].mxu0  ;;  %v1144_v10 = vpop.f32.mrb[8].mxu1 }
 0x12b   :  { %v373_v11 = vpop.f32.mrb[9].mxu0  ;;  %v469_v12 = vpop.f32.mrb[9].mxu1  ;;  %v382_v15 = vadd.f32 %v1120_v9, %v1341_v33  ;;  %v478_v16 = vadd.f32 %v1144_v10, %v1341_v33 }
 0x12c   :  { %v1121_v13 = vpop.f32.mrb[10].mxu0  ;;  %v1145_v14 = vpop.f32.mrb[10].mxu1  ;;  %v374_v21 = vadd.f32 %v1341_v33, %v373_v11  ;;  %v470_v22 = vadd.f32 %v1341_v33, %v469_v12 }
 0x12d   :  { %v385_v17 = vadd.f32 %v1121_v13, %v1341_v33  ;;  %v481_v18 = vadd.f32 %v1145_v14, %v1341_v33  ;;  %v376_v19 = vpop.f32.mrb[11].mxu0  ;;  %v472_v20 = vpop.f32.mrb[11].mxu1 }
 0x12e   :  { %v377_v23 = vadd.f32 %v1341_v33, %v376_v19  ;;  %v473_v24 = vadd.f32 %v1341_v33, %v472_v20 }
 0x12f   :  { %v947_v25 = vpack.c.bf16 %v385_v17, %v382_v15  ;;  %v1007_v26 = vpack.c.bf16 %v481_v18, %v478_v16 }
 0x130   :  { %v942_v27 = vpack.c.bf16 %v377_v23, %v374_v21  ;;  %v1002_v28 = vpack.c.bf16 %v473_v24, %v470_v22 }
 0x131   :  { %1043 = vst [vmem:[#allocation7 + $0x28] sm:$0xff] %v947_v25   ;;  %1055 = vst [vmem:[#allocation7 + $0x88] sm:$0xff] %v1007_v26  }
 0x132   :  { %1042 = vst [vmem:[#allocation7 + $0x20] sm:$0xff] %v942_v27   ;;  %1054 = vst [vmem:[#allocation7 + $0x80] sm:$0xff] %v1002_v28   ;;  %v1124_v29 = vpop.f32.mrb[12].mxu0  ;;  %v1148_v30 = vpop.f32.mrb[12].mxu1 }
 0x133   :  { %v389_v31 = vpop.f32.mrb[13].mxu0  ;;  %v485_v32 = vpop.f32.mrb[13].mxu1  ;;  %v398_v36 = vadd.f32 %v1124_v29, %v1341_v33  ;;  %v494_v37 = vadd.f32 %v1148_v30, %v1341_v33 }
 0x134   :  { %v1125_v34 = vpop.f32.mrb[14].mxu0  ;;  %v1149_v35 = vpop.f32.mrb[14].mxu1  ;;  %v390_v42 = vadd.f32 %v1341_v33, %v389_v31  ;;  %v486_v43 = vadd.f32 %v1341_v33, %v485_v32 }
 0x135   :  { %v401_v38 = vadd.f32 %v1125_v34, %v1341_v33  ;;  %v497_v39 = vadd.f32 %v1149_v35, %v1341_v33  ;;  %v392_v40 = vpop.f32.mrb[15].mxu0  ;;  %v488_v41 = vpop.f32.mrb[15].mxu1 }
 0x136   :  { %v393_v44 = vadd.f32 %v1341_v33, %v392_v40  ;;  %v489_v45 = vadd.f32 %v1341_v33, %v488_v41 }
 0x137   :  { %v957_v46 = vpack.c.bf16 %v401_v38, %v398_v36  ;;  %v1017_v47 = vpack.c.bf16 %v497_v39, %v494_v37 }
 0x138   :  { %v952_v48 = vpack.c.bf16 %v393_v44, %v390_v42  ;;  %v1012_v49 = vpack.c.bf16 %v489_v45, %v486_v43 }
 0x139   :  { %1045 = vst [vmem:[#allocation7 + $0x38] sm:$0xff] %v957_v46   ;;  %1057 = vst [vmem:[#allocation7 + $0x98] sm:$0xff] %v1017_v47  }
 0x13a   :  { %1044 = vst [vmem:[#allocation7 + $0x30] sm:$0xff] %v952_v48   ;;  %1056 = vst [vmem:[#allocation7 + $0x90] sm:$0xff] %v1012_v49   ;;  %v1128_v50 = vpop.f32.mrb[16].mxu0  ;;  %v1152_v51 = vpop.f32.mrb[16].mxu1 }
 0x13b   :  { %v405_v52 = vpop.f32.mrb[17].mxu0  ;;  %v501_v53 = vpop.f32.mrb[17].mxu1  ;;  %v414_v56 = vadd.f32 %v1128_v50, %v1341_v33  ;;  %v510_v57 = vadd.f32 %v1152_v51, %v1341_v33 }
 0x13c   :  { %v1129_v54 = vpop.f32.mrb[18].mxu0  ;;  %v1153_v55 = vpop.f32.mrb[18].mxu1  ;;  %v406_v62 = vadd.f32 %v1341_v33, %v405_v52  ;;  %v502_v63 = vadd.f32 %v1341_v33, %v501_v53 }
 0x13d   :  { %v417_v58 = vadd.f32 %v1129_v54, %v1341_v33  ;;  %v513_v59 = vadd.f32 %v1153_v55, %v1341_v33  ;;  %v408_v60 = vpop.f32.mrb[19].mxu0  ;;  %v504_v61 = vpop.f32.mrb[19].mxu1 }
 0x13e   :  { %v409_v0 = vadd.f32 %v1341_v33, %v408_v60  ;;  %v505_v1 = vadd.f32 %v1341_v33, %v504_v61 }
 0x13f   :  { %v967_v2 = vpack.c.bf16 %v417_v58, %v414_v56  ;;  %v1027_v3 = vpack.c.bf16 %v513_v59, %v510_v57 }
 0x140   :  { %v962_v4 = vpack.c.bf16 %v409_v0, %v406_v62  ;;  %v1022_v5 = vpack.c.bf16 %v505_v1, %v502_v63 }
 0x141   :  { %1047 = vst [vmem:[#allocation7 + $0x48] sm:$0xff] %v967_v2   ;;  %1059 = vst [vmem:[#allocation7 + $0xa8] sm:$0xff] %v1027_v3  }
 0x142   :  { %1046 = vst [vmem:[#allocation7 + $0x40] sm:$0xff] %v962_v4   ;;  %1058 = vst [vmem:[#allocation7 + $0xa0] sm:$0xff] %v1022_v5   ;;  %v1132_v6 = vpop.f32.mrb[20].mxu0  ;;  %v1156_v7 = vpop.f32.mrb[20].mxu1 }
 0x143   :  { %v421_v8 = vpop.f32.mrb[21].mxu0  ;;  %v517_v9 = vpop.f32.mrb[21].mxu1  ;;  %v430_v12 = vadd.f32 %v1132_v6, %v1341_v33  ;;  %v526_v13 = vadd.f32 %v1156_v7, %v1341_v33 }
 0x144   :  { %v1133_v10 = vpop.f32.mrb[22].mxu0  ;;  %v1157_v11 = vpop.f32.mrb[22].mxu1  ;;  %v422_v18 = vadd.f32 %v1341_v33, %v421_v8  ;;  %v518_v19 = vadd.f32 %v1341_v33, %v517_v9 }
 0x145   :  { %v433_v14 = vadd.f32 %v1133_v10, %v1341_v33  ;;  %v529_v15 = vadd.f32 %v1157_v11, %v1341_v33  ;;  %v424_v16 = vpop.f32.mrb[23].mxu0  ;;  %v520_v17 = vpop.f32.mrb[23].mxu1 }
 0x146   :  { %v425_v20 = vadd.f32 %v1341_v33, %v424_v16  ;;  %v521_v21 = vadd.f32 %v1341_v33, %v520_v17 }
 0x147   :  { %v977_v22 = vpack.c.bf16 %v433_v14, %v430_v12  ;;  %v1037_v23 = vpack.c.bf16 %v529_v15, %v526_v13 }
 0x148   :  { %v972_v24 = vpack.c.bf16 %v425_v20, %v422_v18  ;;  %v1032_v25 = vpack.c.bf16 %v521_v21, %v518_v19 }
 0x149   :  { %1049 = vst [vmem:[#allocation7 + $0x58] sm:$0xff] %v977_v22   ;;  %1061 = vst [vmem:[#allocation7 + $0xb8] sm:$0xff] %v1037_v23  }
 0x14a   :  { %1048 = vst [vmem:[#allocation7 + $0x50] sm:$0xff] %v972_v24   ;;  %1060 = vst [vmem:[#allocation7 + $0xb0] sm:$0xff] %v1032_v25  }
 0x14b   :  { %1266 = shalt.err (!%p1263_p6)
}
 0x14c   :  { %s1267_s15 = scalar_lea.hbm %s1409_s3, 3072 }
 0x14d   :  { %p1268_p7 = scmp.ne.s32.totalorder %s1409_s3, %s1267_s15  ;;  %p1271_p8 = scmp.lt.u32.totalorder %s1267_s15, %s1409_s3 }
 0x14f   :  { %p1273_p9 = pnand %p1271_p8, %p1268_p7 }
 0x151   :  { %1276 = shalt.err (!%p1273_p9)
}
 0x152   :  { %783 = dma.vmem_to_hbm [thread:$0]  %s778_s11, 3072, %s1409_s3, [#allocation4], %s1284_s22, %s1284_s22, %s1285_s23  }
 0x153   :  { %1281 = dma.done.wait [#allocation4], 3072  }
 0x154   :  { %1282 = vsyncadd [#allocation4], 4294964224 }
 0x155   :  { %787 = vsyncpa [#allocation3], 1 }
 0x156   :  { %788 = vsyncpa [#allocation6], 1 }
 0x157   :  { %789 = vsyncpa [#allocation4], 1 }

</bundles_post_ra>
